<compile_context>
chip_gen: v5e
topology: v5e:2x2
jax: 0.10.0
libtpu: 0.0.40
codegen_flags: <defaults>
</compile_context>

<pallas_src>
import functools

import jax
import jax.numpy as jnp
from jax.experimental import pallas as pl
from jax.experimental.pallas import tpu as pltpu


def _round8(x):
    return ((x + 7) // 8) * 8


# ---------------------------------------------------------------------------
# Single fused Pallas kernel: the entire GCN_multi forward.
#   g_ref : graph slab  (2*n_pad + p_rows, n_pad)   [X_all | A_all | P_all]
#   w_ref : weight slab (R, width)                  all weights/biases
# ---------------------------------------------------------------------------
def _gcn_multi_fused_kernel(g_ref, w_ref, out_ref, *,
                            offs, n_pad, p_rows, num_graphs, n_gcn_layers,
                            chr_cols, slv_cols):
    def mm(a, b):
        return jnp.dot(a, b, preferred_element_type=jnp.float32)

    g = num_graphs
    X = g_ref[0:n_pad, :]                        # (n_pad, n_pad), feats in cols 0:F
    A = g_ref[n_pad:2 * n_pad, :]                # merged block-diag adjacency
    P = g_ref[2 * n_pad:2 * n_pad + p_rows, :]   # pooling rows (chr graphs, slv graphs)

    # Merged GCN stack: all 4 ensemble members batched along the 128-lane axis.
    x = X
    for i in range(n_gcn_layers):
        r0, r1 = offs[f"gcn{i}"]
        x = jnp.maximum(mm(A, mm(x, w_ref[r0:r1, :])), 0.0)

    pooled = mm(P, x)                                         # (p_rows, width)
    rep_chr = pooled[0:g, 0:chr_cols]                         # (G, e0*dim/2)
    rep_slv = pooled[g:2 * g, chr_cols:chr_cols + slv_cols]   # (G, e1*dim/2)

    # Per-ensemble FC heads (block-diagonal) realised as two dots + bias row.
    hc0, hc1 = offs["head_w_chr"]
    hs0, hs1 = offs["head_w_slv"]
    hb0, _ = offs["head_b"]
    hg = mm(rep_chr, w_ref[hc0:hc1, :]) + mm(rep_slv, w_ref[hs0:hs1, :])
    hg = jnp.maximum(hg + w_ref[hb0:hb0 + 1, :], 0.0)         # (G, width)

    f1w0, f1w1 = offs["fc1_w"]
    f1b0, _ = offs["fc1_b"]
    hg = jnp.maximum(mm(hg, w_ref[f1w0:f1w1, :]) + w_ref[f1b0:f1b0 + 1, :], 0.0)

    # fc2 (dim -> 1) as a VPU multiply + lane reduction (no 1-lane MXU pass).
    f2w0, _ = offs["fc2_w"]
    f2b0, _ = offs["fc2_b"]
    s = jnp.sum(hg * w_ref[f2w0:f2w0 + 1, :], axis=-1, keepdims=True)   # (G, 1)
    # Lane-dense store: every lane holds the scalar result + fc2 bias.
    out_ref[...] = (s + w_ref[f2b0:f2b0 + 1, :]).astype(out_ref.dtype)  # (G, width)


# ---------------------------------------------------------------------------
# Graph glue (plain JAX, runs inside the jitted wrapper)
# ---------------------------------------------------------------------------
def build_adjacency(edge_index, num_nodes, aggregation):
    """A[i, j] = number of edges j -> i (PyG message passing src->dst)."""
    src, dst = edge_index[0], edge_index[1]
    A = jnp.zeros((num_nodes, num_nodes), jnp.float32)
    A = A.at[dst, src].add(1.0)
    if aggregation == "mean":
        deg = A.sum(axis=1, keepdims=True)
        A = A / jnp.maximum(deg, 1.0)
    return A


def build_pooling(batch, num_graphs, pooling):
    """P[g, n] = 1 if node n belongs to graph g (global_add_pool == P @ X)."""
    n = batch.shape[0]
    P = jnp.zeros((num_graphs, n), jnp.float32)
    P = P.at[batch, jnp.arange(n)].set(1.0)
    if pooling == "mean":
        cnt = P.sum(axis=1, keepdims=True)
        P = P / jnp.maximum(cnt, 1.0)
    return P


# ---------------------------------------------------------------------------
# Parameter initialization (deterministic, synthetic)
# ---------------------------------------------------------------------------
def init_params(key, num_node_feats, dim, n_layers, ensemble):
    half = dim // 2

    def gcn_dims(nl):
        dims = [(num_node_feats, dim)]
        dims += [(dim, dim)] * max(0, nl - 2)
        dims += [(dim, half)]
        return dims

    def lin(key, din, dout):
        kw, kb = jax.random.split(key)
        w = jax.random.normal(kw, (din, dout), jnp.float32) * 0.1
        b = jax.random.normal(kb, (dout,), jnp.float32) * 0.1
        return w, b

    params = {"cgc": [], "sgc": [], "cfc": [], "sfc": []}
    keys = jax.random.split(key, 8)

    # GCN weights (stored [in, out], no bias)
    k = keys[0]
    for _ in range(ensemble[0]):
        layers = []
        for (din, dout) in gcn_dims(n_layers[0]):
            k, sub = jax.random.split(k)
            layers.append(jax.random.normal(sub, (din, dout), jnp.float32) * 0.1)
        params["cgc"].append(layers)
    k = keys[1]
    for _ in range(ensemble[1]):
        layers = []
        for (din, dout) in gcn_dims(n_layers[1]):
            k, sub = jax.random.split(k)
            layers.append(jax.random.normal(sub, (din, dout), jnp.float32) * 0.1)
        params["sgc"].append(layers)

    # per-ensemble FC heads: Linear(dim/2 -> dim)
    k = keys[2]
    for _ in range(ensemble[0]):
        k, sub = jax.random.split(k)
        params["cfc"].append(lin(sub, half, dim))
    k = keys[3]
    for _ in range(ensemble[1]):
        k, sub = jax.random.split(k)
        params["sfc"].append(lin(sub, half, dim))

    params["fc1"] = lin(keys[4], (ensemble[0] + ensemble[1]) * dim, dim)
    params["fc2"] = lin(keys[5], dim, 1)
    return params


def _block_diag(mats):
    rows = sum(m.shape[0] for m in mats)
    cols = sum(m.shape[1] for m in mats)
    out = jnp.zeros((rows, cols), jnp.float32)
    r = c = 0
    for m in mats:
        out = out.at[r:r + m.shape[0], c:c + m.shape[1]].set(m)
        r += m.shape[0]
        c += m.shape[1]
    return out


# ---------------------------------------------------------------------------
# One-time host-side weight-slab packing (single contiguous (R, width) slab)
# ---------------------------------------------------------------------------
def pack_weight_slab(params, *, num_node_feats, dim, n_layers, ensemble, n_pad):
    e0, e1 = ensemble
    E = e0 + e1
    half = dim // 2
    width = E * dim
    # TODO(synk): merged-stream packing assumes equal GCN depth for both streams.
    assert n_layers[0] == n_layers[1]
    assert num_node_feats <= n_pad
    L = n_layers[0]

    members = list(params["cgc"]) + list(params["sgc"])

    blocks = []  # (name, matrix) — logical rows; cols <= width (zero-padded in slab)

    # Layer 0: member weights concatenated along output dim; rows padded to
    # n_pad so it multiplies the (n_pad, n_pad) X block of the graph slab.
    w0 = jnp.concatenate([m[0] for m in members], axis=1)          # (F, E*dim)
    w0 = jnp.zeros((n_pad, width), jnp.float32).at[
        :num_node_feats, :w0.shape[1]].set(w0)
    blocks.append(("gcn0", w0))
    for i in range(1, L):
        blocks.append((f"gcn{i}", _block_diag([m[i] for m in members])))

    # Per-member heads, placed so hg = concat(ind_chr... , ind_slv...).
    hw_chr = jnp.zeros((e0 * half, width), jnp.float32)
    for m in range(e0):
        w, _ = params["cfc"][m]
        hw_chr = hw_chr.at[m * half:(m + 1) * half, m * dim:(m + 1) * dim].set(w)
    hw_slv = jnp.zeros((e1 * half, width), jnp.float32)
    for m in range(e1):
        w, _ = params["sfc"][m]
        hw_slv = hw_slv.at[m * half:(m + 1) * half,
                           (e0 + m) * dim:(e0 + m + 1) * dim].set(w)
    head_b = jnp.concatenate([b for _, b in params["cfc"]] +
                             [b for _, b in params["sfc"]]).reshape(1, -1)
    blocks += [("head_w_chr", hw_chr), ("head_w_slv", hw_slv), ("head_b", head_b)]

    fc1_w, fc1_b = params["fc1"]
    fc2_w, fc2_b = params["fc2"]
    blocks += [("fc1_w", fc1_w),                              # (E*dim, dim)
               ("fc1_b", fc1_b.reshape(1, -1)),               # (1, dim)
               ("fc2_w", fc2_w.reshape(1, -1)),               # (1, dim)
               ("fc2_b", jnp.full((1, width), fc2_b[0], jnp.float32))]

    offs, placed, cur = {}, [], 0
    for name, mat in blocks:
        offs[name] = (cur, cur + mat.shape[0])
        placed.append((cur, mat))
        cur = _round8(cur + mat.shape[0])

    slab = jnp.zeros((cur, width), jnp.float32)
    for start, mat in placed:
        slab = slab.at[start:start + mat.shape[0], :mat.shape[1]].set(mat)
    return slab, offs


# ---------------------------------------------------------------------------
# jitted end-to-end forward (graph-slab assembly + single pallas_call)
# ---------------------------------------------------------------------------
def make_forward(offs, *, num_node_feats, dim, n_layers, ensemble, num_graphs,
                 n_pad, p_rows, aggregation, pooling):
    e0, e1 = ensemble
    half = dim // 2
    width = (e0 + e1) * dim

    kernel = functools.partial(
        _gcn_multi_fused_kernel,
        offs=offs, n_pad=n_pad, p_rows=p_rows, num_graphs=num_graphs,
        n_gcn_layers=n_layers[0], chr_cols=e0 * half, slv_cols=e1 * half)

    vmem = lambda: pl.BlockSpec(memory_space=pltpu.MemorySpace.VMEM)
    call = pl.pallas_call(
        kernel,
        out_shape=jax.ShapeDtypeStruct((num_graphs, width), jnp.float32),
        in_specs=[vmem(), vmem()],
        out_specs=vmem(),
    )

    def forward(w_slab, chr_x, chr_edge_index, chr_batch,
                slv_x, slv_edge_index, slv_batch):
        n_chr = chr_x.shape[0]
        n_slv = slv_x.shape[0]
        chr_A = build_adjacency(chr_edge_index, n_chr, aggregation)
        slv_A = build_adjacency(slv_edge_index, n_slv, aggregation)
        chr_P = build_pooling(chr_batch, num_graphs, pooling)
        slv_P = build_pooling(slv_batch, num_graphs, pooling)

        # Graph slab: [X_all (n_pad rows) | A_all (n_pad rows) | P_all (p_rows)]
        g_slab = jnp.zeros((2 * n_pad + p_rows, n_pad), jnp.float32)
        g_slab = g_slab.at[0:n_chr, 0:num_node_feats].set(chr_x)
        g_slab = g_slab.at[n_chr:n_chr + n_slv, 0:num_node_feats].set(slv_x)
        g_slab = g_slab.at[n_pad:n_pad + n_chr, 0:n_chr].set(chr_A)
        g_slab = g_slab.at[n_pad + n_chr:n_pad + n_chr + n_slv,
                           n_chr:n_chr + n_slv].set(slv_A)
        g_slab = g_slab.at[2 * n_pad:2 * n_pad + num_graphs, 0:n_chr].set(chr_P)
        g_slab = g_slab.at[2 * n_pad + num_graphs:2 * n_pad + 2 * num_graphs,
                           n_chr:n_chr + n_slv].set(slv_P)

        out = call(g_slab, w_slab)          # (G, width), lane-dense
        return out[:, :1]                   # (G, 1)

    return jax.jit(forward)


# ---------------------------------------------------------------------------
# Pure-JAX reference (un-fused, per-ensemble) for a correctness check
# ---------------------------------------------------------------------------
def reference_forward(params, chr_x, chr_A, chr_P, slv_x, slv_A, slv_P,
                      n_layers, ensemble):
    hp = jax.lax.Precision.HIGHEST

    def mm(a, b):
        return jnp.dot(a, b, precision=hp)

    rep_chr, rep_slv = [], []
    for e in range(ensemble[0]):
        c = chr_x
        for i in range(n_layers[0]):
            c = jnp.maximum(mm(chr_A, mm(c, params["cgc"][e][i])), 0.0)
        rep_chr.append(mm(chr_P, c))
    for e in range(ensemble[1]):
        s = slv_x
        for i in range(n_layers[1]):
            s = jnp.maximum(mm(slv_A, mm(s, params["sgc"][e][i])), 0.0)
        rep_slv.append(mm(slv_P, s))

    ind = [jnp.maximum(mm(rep_chr[e], params["cfc"][e][0]) + params["cfc"][e][1], 0.0)
           for e in range(ensemble[0])]
    ind += [jnp.maximum(mm(rep_slv[e], params["sfc"][e][0]) + params["sfc"][e][1], 0.0)
            for e in range(ensemble[1])]
    hg = jnp.concatenate(ind, axis=1)
    hg = jnp.maximum(mm(hg, params["fc1"][0]) + params["fc1"][1], 0.0)
    return mm(hg, params["fc2"][0]) + params["fc2"][1]


# ---------------------------------------------------------------------------
# Main
# ---------------------------------------------------------------------------
if __name__ == "__main__":
    # Module configuration
    num_node_feats = 8
    dim = 32
    n_layers = [3, 3]
    ensemble = [2, 2]
    aggregation = "add"   # GCNConv aggr
    pooling = "add"       # global_add_pool

    # Graph sizes
    num_graphs = 2
    n_chr_nodes = 16      # 8 nodes per graph (chromophore)
    n_slv_nodes = 12      # 6 nodes per graph (solvent)
    n_pad = _round8(n_chr_nodes + n_slv_nodes)   # merged, padded node count (32)
    p_rows = _round8(2 * num_graphs)             # pooling rows in the graph slab (8)

    key = jax.random.PRNGKey(0)
    k_p, k_cx, k_sx = jax.random.split(key, 3)

    params = init_params(k_p, num_node_feats, dim, n_layers, ensemble)
    w_slab, offs = pack_weight_slab(
        params, num_node_feats=num_node_feats, dim=dim, n_layers=n_layers,
        ensemble=ensemble, n_pad=n_pad)

    # Node features
    chr_x = jax.random.normal(k_cx, (n_chr_nodes, num_node_feats), jnp.float32)
    slv_x = jax.random.normal(k_sx, (n_slv_nodes, num_node_feats), jnp.float32)

    # Batch assignment vectors
    chr_batch = jnp.repeat(jnp.arange(num_graphs), n_chr_nodes // num_graphs)
    slv_batch = jnp.repeat(jnp.arange(num_graphs), n_slv_nodes // num_graphs)

    # Deterministic bidirectional chain edges within each graph
    def chain_edges(nodes_per_graph, num_graphs):
        srcs, dsts = [], []
        for g in range(num_graphs):
            off = g * nodes_per_graph
            for i in range(nodes_per_graph - 1):
                srcs += [off + i, off + i + 1]
                dsts += [off + i + 1, off + i]
        return jnp.array([srcs, dsts], dtype=jnp.int32)

    chr_edge_index = chain_edges(n_chr_nodes // num_graphs, num_graphs)
    slv_edge_index = chain_edges(n_slv_nodes // num_graphs, num_graphs)

    forward = make_forward(
        offs, num_node_feats=num_node_feats, dim=dim, n_layers=n_layers,
        ensemble=ensemble, num_graphs=num_graphs, n_pad=n_pad, p_rows=p_rows,
        aggregation=aggregation, pooling=pooling)

    out = forward(w_slab, chr_x, chr_edge_index, chr_batch,
                  slv_x, slv_edge_index, slv_batch)
    out = jax.block_until_ready(out)

    assert out.shape == (num_graphs, 1), out.shape
    assert jnp.all(jnp.isfinite(out))

    # Numerical check against the un-fused pure-JAX reference
    chr_A = build_adjacency(chr_edge_index, n_chr_nodes, aggregation)
    slv_A = build_adjacency(slv_edge_index, n_slv_nodes, aggregation)
    chr_P = build_pooling(chr_batch, num_graphs, pooling)
    slv_P = build_pooling(slv_batch, num_graphs, pooling)
    ref = reference_forward(params, chr_x, chr_A, chr_P, slv_x, slv_A, slv_P,
                            n_layers, ensemble)
    assert jnp.allclose(out, ref, rtol=1e-3, atol=1e-3), (out, ref)

    print("KERNEL_OK")
</pallas_src>

<mosaic_0001>
module attributes {stable_mosaic.version = 11 : i64} {
  func.func @_gcn_multi_fused_kernel(%arg0: memref<72x32xf32, #tpu.memory_space<vmem>>, %arg1: memref<512x128xf32, #tpu.memory_space<vmem>>, %arg2: memref<2x128xf32, #tpu.memory_space<vmem>>) attributes {dimension_semantics = [], scalar_prefetch = 0 : i64, scratch_operands = 0 : i64, tpu.core_type = #tpu.core_type<tc>} {
    %c0 = arith.constant 0 : index
    %c0_0 = arith.constant 0 : index
    %0 = vector.load %arg0[%c0, %c0_0] : memref<72x32xf32, #tpu.memory_space<vmem>>, vector<32x32xf32>
    %c32 = arith.constant 32 : index
    %c0_1 = arith.constant 0 : index
    %1 = vector.load %arg0[%c32, %c0_1] : memref<72x32xf32, #tpu.memory_space<vmem>>, vector<32x32xf32>
    %c64 = arith.constant 64 : index
    %c0_2 = arith.constant 0 : index
    %2 = vector.load %arg0[%c64, %c0_2] : memref<72x32xf32, #tpu.memory_space<vmem>>, vector<8x32xf32>
    %c0_3 = arith.constant 0 : index
    %c0_4 = arith.constant 0 : index
    %3 = vector.load %arg1[%c0_3, %c0_4] : memref<512x128xf32, #tpu.memory_space<vmem>>, vector<32x128xf32>
    %cst = arith.constant dense<0.000000e+00> : vector<32x128xf32>
    %4 = tpu.matmul %0, %3, %cst {dimension_numbers = #tpu.dot_dimension_numbers<[1], [0], [0], [1], [0, 0, 1, 1], [], []>} : vector<32x32xf32>, vector<32x128xf32>, vector<32x128xf32> -> vector<32x128xf32>
    %cst_5 = arith.constant dense<0.000000e+00> : vector<32x128xf32>
    %5 = tpu.matmul %1, %4, %cst_5 {dimension_numbers = #tpu.dot_dimension_numbers<[1], [0], [0], [1], [0, 0, 1, 1], [], []>} : vector<32x32xf32>, vector<32x128xf32>, vector<32x128xf32> -> vector<32x128xf32>
    %cst_6 = arith.constant 0.000000e+00 : f32
    %6 = vector.broadcast %cst_6 : f32 to vector<32x128xf32>
    %7 = arith.maximumf %5, %6 : vector<32x128xf32>
    %c32_7 = arith.constant 32 : index
    %c0_8 = arith.constant 0 : index
    %8 = vector.load %arg1[%c32_7, %c0_8] : memref<512x128xf32, #tpu.memory_space<vmem>>, vector<128x128xf32>
    %cst_9 = arith.constant dense<0.000000e+00> : vector<32x128xf32>
    %9 = tpu.matmul %7, %8, %cst_9 {dimension_numbers = #tpu.dot_dimension_numbers<[1], [0], [0], [1], [0, 0, 1, 1], [], []>} : vector<32x128xf32>, vector<128x128xf32>, vector<32x128xf32> -> vector<32x128xf32>
    %cst_10 = arith.constant dense<0.000000e+00> : vector<32x128xf32>
    %10 = tpu.matmul %1, %9, %cst_10 {dimension_numbers = #tpu.dot_dimension_numbers<[1], [0], [0], [1], [0, 0, 1, 1], [], []>} : vector<32x32xf32>, vector<32x128xf32>, vector<32x128xf32> -> vector<32x128xf32>
    %cst_11 = arith.constant 0.000000e+00 : f32
    %11 = vector.broadcast %cst_11 : f32 to vector<32x128xf32>
    %12 = arith.maximumf %10, %11 : vector<32x128xf32>
    %c160 = arith.constant 160 : index
    %c0_12 = arith.constant 0 : index
    %13 = vector.load %arg1[%c160, %c0_12] : memref<512x128xf32, #tpu.memory_space<vmem>>, vector<128x128xf32>
    %cst_13 = arith.constant dense<0.000000e+00> : vector<32x128xf32>
    %14 = tpu.matmul %12, %13, %cst_13 {dimension_numbers = #tpu.dot_dimension_numbers<[1], [0], [0], [1], [0, 0, 1, 1], [], []>} : vector<32x128xf32>, vector<128x128xf32>, vector<32x128xf32> -> vector<32x128xf32>
    %cst_14 = arith.constant dense<0.000000e+00> : vector<32x128xf32>
    %15 = tpu.matmul %1, %14, %cst_14 {dimension_numbers = #tpu.dot_dimension_numbers<[1], [0], [0], [1], [0, 0, 1, 1], [], []>} : vector<32x32xf32>, vector<32x128xf32>, vector<32x128xf32> -> vector<32x128xf32>
    %cst_15 = arith.constant 0.000000e+00 : f32
    %16 = vector.broadcast %cst_15 : f32 to vector<32x128xf32>
    %17 = arith.maximumf %15, %16 : vector<32x128xf32>
    %cst_16 = arith.constant dense<0.000000e+00> : vector<8x128xf32>
    %18 = tpu.matmul %2, %17, %cst_16 {dimension_numbers = #tpu.dot_dimension_numbers<[1], [0], [0], [1], [0, 0, 1, 1], [], []>} : vector<8x32xf32>, vector<32x128xf32>, vector<8x128xf32> -> vector<8x128xf32>
    %19 = vector.extract_strided_slice %18 {offsets = [0, 0], sizes = [2, 32], strides = [1, 1]} : vector<8x128xf32> to vector<2x32xf32>
    %20 = vector.extract_strided_slice %18 {offsets = [2, 32], sizes = [2, 32], strides = [1, 1]} : vector<8x128xf32> to vector<2x32xf32>
    %c288 = arith.constant 288 : index
    %c0_17 = arith.constant 0 : index
    %21 = vector.load %arg1[%c288, %c0_17] : memref<512x128xf32, #tpu.memory_space<vmem>>, vector<32x128xf32>
    %cst_18 = arith.constant dense<0.000000e+00> : vector<2x128xf32>
    %22 = tpu.matmul %19, %21, %cst_18 {dimension_numbers = #tpu.dot_dimension_numbers<[1], [0], [0], [1], [0, 0, 1, 1], [], []>} : vector<2x32xf32>, vector<32x128xf32>, vector<2x128xf32> -> vector<2x128xf32>
    %c320 = arith.constant 320 : index
    %c0_19 = arith.constant 0 : index
    %23 = vector.load %arg1[%c320, %c0_19] : memref<512x128xf32, #tpu.memory_space<vmem>>, vector<32x128xf32>
    %cst_20 = arith.constant dense<0.000000e+00> : vector<2x128xf32>
    %24 = tpu.matmul %20, %23, %cst_20 {dimension_numbers = #tpu.dot_dimension_numbers<[1], [0], [0], [1], [0, 0, 1, 1], [], []>} : vector<2x32xf32>, vector<32x128xf32>, vector<2x128xf32> -> vector<2x128xf32>
    %25 = arith.addf %22, %24 : vector<2x128xf32>
    %c352 = arith.constant 352 : index
    %c0_21 = arith.constant 0 : index
    %26 = vector.load %arg1[%c352, %c0_21] : memref<512x128xf32, #tpu.memory_space<vmem>>, vector<1x128xf32>
    %27 = vector.broadcast %26 : vector<1x128xf32> to vector<2x128xf32>
    %28 = arith.addf %25, %27 : vector<2x128xf32>
    %cst_22 = arith.constant 0.000000e+00 : f32
    %29 = vector.broadcast %cst_22 : f32 to vector<2x128xf32>
    %30 = arith.maximumf %28, %29 : vector<2x128xf32>
    %c360 = arith.constant 360 : index
    %c0_23 = arith.constant 0 : index
    %31 = vector.load %arg1[%c360, %c0_23] : memref<512x128xf32, #tpu.memory_space<vmem>>, vector<128x128xf32>
    %cst_24 = arith.constant dense<0.000000e+00> : vector<2x128xf32>
    %32 = tpu.matmul %30, %31, %cst_24 {dimension_numbers = #tpu.dot_dimension_numbers<[1], [0], [0], [1], [0, 0, 1, 1], [], []>} : vector<2x128xf32>, vector<128x128xf32>, vector<2x128xf32> -> vector<2x128xf32>
    %c488 = arith.constant 488 : index
    %c0_25 = arith.constant 0 : index
    %33 = vector.load %arg1[%c488, %c0_25] : memref<512x128xf32, #tpu.memory_space<vmem>>, vector<1x128xf32>
    %34 = vector.broadcast %33 : vector<1x128xf32> to vector<2x128xf32>
    %35 = arith.addf %32, %34 : vector<2x128xf32>
    %cst_26 = arith.constant 0.000000e+00 : f32
    %36 = vector.broadcast %cst_26 : f32 to vector<2x128xf32>
    %37 = arith.maximumf %35, %36 : vector<2x128xf32>
    %c496 = arith.constant 496 : index
    %c0_27 = arith.constant 0 : index
    %38 = vector.load %arg1[%c496, %c0_27] : memref<512x128xf32, #tpu.memory_space<vmem>>, vector<1x128xf32>
    %39 = vector.broadcast %38 : vector<1x128xf32> to vector<2x128xf32>
    %40 = arith.mulf %37, %39 : vector<2x128xf32>
    %cst_28 = arith.constant dense<0.000000e+00> : vector<2xf32>
    %41 = vector.multi_reduction <add>, %40, %cst_28 [1] : vector<2x128xf32> to vector<2xf32>
    %42 = vector.shape_cast %41 : vector<2xf32> to vector<2x1xf32>
    %c504 = arith.constant 504 : index
    %c0_29 = arith.constant 0 : index
    %43 = vector.load %arg1[%c504, %c0_29] : memref<512x128xf32, #tpu.memory_space<vmem>>, vector<1x128xf32>
    %44 = vector.broadcast %42 : vector<2x1xf32> to vector<2x128xf32>
    %45 = vector.broadcast %43 : vector<1x128xf32> to vector<2x128xf32>
    %46 = arith.addf %44, %45 : vector<2x128xf32>
    %c0_30 = arith.constant 0 : index
    %c0_31 = arith.constant 0 : index
    %47 = vector.load %arg2[%c0_30, %c0_31] : memref<2x128xf32, #tpu.memory_space<vmem>>, vector<2x128xf32>
    tpu.vector_store %arg2[%c0_30, %c0_31], %46 {strides = array<i32>} : memref<2x128xf32, #tpu.memory_space<vmem>>, vector<2x128xf32>,
    return
  }
}

</mosaic_0001>

<bundles_post_ra>
// kernel: forward.1
= control target key start
LH: loop header
LB: loop body
LE: loop exit
PB: predicated region body
PF: predicated region fallthrough
CT: control target
= control target key end

     0   :  { %vm24_vm0 = vcmask 261120   ;;  %vm392_vm1 = vcmask 1041408   ;;  %s705_s1 = inlined_call_operand.vmem [shape: f32[512,128], index: 1, kind: input, shape index: {}]   ;;  %s706_s0 = inlined_call_operand.vmem [shape: f32[72,32], index: 0, kind: input, shape index: {}]   ;;  %s707_s2 = inlined_call_operand.vmem [shape: f32[2,128], index: 2, kind: output, shape index: {}]  }
   0x1   :  { %v23_v0 = vld [vmem:[%s705_s1 + $0x18] sm:$0xff]  ;;  %v22_v1 = vld [vmem:[%s705_s1 + $0x10] sm:$0xff]  ;;  %v21_v2 = vld [vmem:[%s705_s1 + $0x8] sm:$0xff] }
   0x2   :  { %49 = vmatpush.msra.mxu0 %v23_v0  ;;  %v20_v3 = vld [vmem:[%s705_s1] sm:$0xff]  ;;  %v12_v5 = vld [vmem:[%s706_s0 + $0x8] sm:$0xff]  ;;  %v13_v6 = vld [vmem:[%s706_s0 + $0x10] sm:$0xff] }
   0x3   :  { %v11_v4 = vld [vmem:[%s706_s0] sm:$0xff]  ;;  %v14_v7 = vld [vmem:[%s706_s0 + $0x18] sm:$0xff]  ;;  %v125_v13 = vld [vmem:[%s705_s1 + $0x90] sm:$0xff] }
   0x4   :  { %50 = vmatpush.msra.mxu0 %v22_v1  ;;  %v126_v12 = vld [vmem:[%s705_s1 + $0x98] sm:$0xff]  ;;  %v124_v14 = vld [vmem:[%s705_s1 + $0x88] sm:$0xff]  ;;  %v123_v15 = vld [vmem:[%s705_s1 + $0x80] sm:$0xff] }
   0x5   :  { %127 = vmatpush.msra.mxu2 %v126_v12  ;;  %v487_v16 = vld [vmem:[%s706_s0 + $0x20] sm:$0xff]  ;;  %v122_v17 = vld [vmem:[%s705_s1 + $0x78] sm:$0xff]  ;;  %v121_v18 = vld [vmem:[%s705_s1 + $0x70] sm:$0xff] }
   0x6   :  { %51 = vmatpush.msra.mxu0 %v21_v2  ;;  %v120_v19 = vld [vmem:[%s705_s1 + $0x68] sm:$0xff]  ;;  %v119_v20 = vld [vmem:[%s705_s1 + $0x60] sm:$0xff]  ;;  %v118_v22 = vld [vmem:[%s705_s1 + $0x58] sm:$0xff] }
   0x7   :  { %128 = vmatpush.msra.mxu2 %v125_v13  ;;  %v506_v21 = vld [vmem:[%s706_s0 + $0x28] sm:$0xff]  ;;  %v117_v23 = vld [vmem:[%s705_s1 + $0x50] sm:$0xff]  ;;  %v115_v25 = vld [vmem:[%s705_s1 + $0x40] sm:$0xff] }
   0x8   :  { %52 = vmatpush.msra.mxu0 %v20_v3  ;;  %v116_v24 = vld [vmem:[%s705_s1 + $0x48] sm:$0xff]  ;;  %v525_v26 = vld [vmem:[%s706_s0 + $0x30] sm:$0xff]  ;;  %v114_v27 = vld [vmem:[%s705_s1 + $0x38] sm:$0xff] }
   0x9   :  { %404 = vmatmul.msk.f32.vlgmr.msra.gmra.mxu0 %vm24_vm0, %v11_v4  ;;  %129 = vmatpush.msra.mxu2 %v124_v14  ;;  %v113_v28 = vld [vmem:[%s705_s1 + $0x30] sm:$0xff]  ;;  %v538_v29 = vld [vmem:[%s706_s0 + $0x38] sm:$0xff]  ;;  %v112_v30 = vld [vmem:[%s705_s1 + $0x28] sm:$0xff] }
   0xa   :  { %v111_v31 = vld [vmem:[%s705_s1 + $0x20] sm:$0xff]  ;;  %v204_v44 = vld [vmem:[%s705_s1 + $0x118] sm:$0xff]  ;;  %v203_v45 = vld [vmem:[%s705_s1 + $0x110] sm:$0xff] }
   0xb   :  { %130 = vmatpush.msra.mxu2 %v123_v15  ;;  %205 = vmatpush.msrb.mxu0 %v204_v44  ;;  %v202_v46 = vld [vmem:[%s705_s1 + $0x108] sm:$0xff]  ;;  %v201_v47 = vld [vmem:[%s705_s1 + $0x100] sm:$0xff]  ;;  %v200_v48 = vld [vmem:[%s705_s1 + $0xf8] sm:$0xff] }
   0xc   :  { %v199_v49 = vld [vmem:[%s705_s1 + $0xf0] sm:$0xff]  ;;  %v198_v50 = vld [vmem:[%s705_s1 + $0xe8] sm:$0xff]  ;;  %v197_v51 = vld [vmem:[%s705_s1 + $0xe0] sm:$0xff] }
   0xd   :  { %131 = vmatpush.msra.mxu2 %v122_v17  ;;  %206 = vmatpush.msrb.mxu0 %v203_v45  ;;  %v196_v52 = vld [vmem:[%s705_s1 + $0xd8] sm:$0xff]  ;;  %v195_v53 = vld [vmem:[%s705_s1 + $0xd0] sm:$0xff]  ;;  %v194_v54 = vld [vmem:[%s705_s1 + $0xc8] sm:$0xff] }
   0xe   :  { %v193_v55 = vld [vmem:[%s705_s1 + $0xc0] sm:$0xff]  ;;  %v192_v56 = vld [vmem:[%s705_s1 + $0xb8] sm:$0xff]  ;;  %v191_v57 = vld [vmem:[%s705_s1 + $0xb0] sm:$0xff] }
   0xf   :  { %132 = vmatpush.msra.mxu2 %v121_v18  ;;  %207 = vmatpush.msrb.mxu0 %v202_v46  ;;  %v190_v58 = vld [vmem:[%s705_s1 + $0xa8] sm:$0xff]  ;;  %v189_v59 = vld [vmem:[%s705_s1 + $0xa0] sm:$0xff]  ;;  %v297_v17 = vld [vmem:[%s705_s1 + $0x158] sm:$0xff] }
  0x10   :  { %v296_v18 = vld [vmem:[%s705_s1 + $0x150] sm:$0xff]  ;;  %v424_v45 = vld [vmem:[%s705_s1 + $0x160] ss:$0 sm:$0xff] }
  0x11   :  { %405 = vmatmul.msk.f32.gmra.mxu0 %vm24_vm0, %v12_v5  ;;  %133 = vmatpush.msra.mxu2 %v120_v19  ;;  %v295_v19 = vld [vmem:[%s705_s1 + $0x148] sm:$0xff] }
  0x12   :  { %208 = vmatpush.msrb.mxu0 %v201_v47 }
  0x13   :  { %134 = vmatpush.msra.mxu2 %v119_v20  ;;  %v294_v20 = vld [vmem:[%s705_s1 + $0x140] sm:$0xff] }
  0x14   :  { %209 = vmatpush.msrb.mxu0 %v200_v48 }
  0x15   :  { %135 = vmatpush.msra.mxu2 %v118_v22 }
  0x16   :  { %210 = vmatpush.msrb.mxu0 %v199_v49 }
  0x17   :  { %136 = vmatpush.msra.mxu2 %v117_v23  ;;  %v293_v23 = vld [vmem:[%s705_s1 + $0x138] sm:$0xff] }
  0x18   :  { %211 = vmatpush.msrb.mxu0 %v198_v50  ;;  %v425_v50 = vld [vmem:[%s705_s1 + $0x1e8] ss:$0 sm:$0xff] }
  0x19   :  { %406 = vmatmul.msk.f32.gmra.mxu0 %vm24_vm0, %v13_v6  ;;  %137 = vmatpush.msra.mxu2 %v116_v24  ;;  %v292_v24 = vld [vmem:[%s705_s1 + $0x130] sm:$0xff] }
  0x1a   :  { %212 = vmatpush.msrb.mxu0 %v197_v51 }
  0x1b   :  { %138 = vmatpush.msra.mxu2 %v115_v25  ;;  %v291_v25 = vld [vmem:[%s705_s1 + $0x128] sm:$0xff] }
  0x1c   :  { %213 = vmatpush.msrb.mxu0 %v196_v52 }
  0x1d   :  { %139 = vmatpush.msra.mxu2 %v114_v27  ;;  %v365_v27 = vld [vmem:[%s705_s1 + $0x1e0] sm:$0xff] }
  0x1e   :  { %214 = vmatpush.msrb.mxu0 %v195_v53  ;;  %v426_v53 = vld [vmem:[%s705_s1 + $0x1f0] ss:$0 sm:$0xff] }
  0x1f   :  { %140 = vmatpush.msra.mxu2 %v113_v28  ;;  %v364_v28 = vld [vmem:[%s705_s1 + $0x1d8] sm:$0xff] }
  0x20   :  { %215 = vmatpush.msrb.mxu0 %v194_v54 }
  0x21   :  { %407 = vmatmul.msk.f32.gmra.mxu0 %vm24_vm0, %v14_v7  ;;  %141 = vmatpush.msra.mxu2 %v112_v30  ;;  %v362_v30 = vld [vmem:[%s705_s1 + $0x1c8] sm:$0xff] }
  0x22   :  { %216 = vmatpush.msrb.mxu0 %v193_v55 }
  0x23   :  { %142 = vmatpush.msra.mxu2 %v111_v31  ;;  %v361_v31 = vld [vmem:[%s705_s1 + $0x1c0] sm:$0xff] }
  0x24   :  { %217 = vmatpush.msrb.mxu0 %v192_v56 }
  0x25   :  { %368 = vmatpush.msrb.mxu2 %v365_v27 }
  0x26   :  { %218 = vmatpush.msrb.mxu0 %v191_v57  ;;  %v427_v57 = vld [vmem:[%s705_s1 + $0x1f8] ss:$0 sm:$0xff] }
  0x27   :  { %369 = vmatpush.msrb.mxu2 %v364_v28 }
  0x28   :  { %219 = vmatpush.msrb.mxu0 %v190_v58 }
  0x2a   :  { %220 = vmatpush.msrb.mxu0 %v189_v59 }
  0x86   :  { %v54_v8 = vpop.f32.mrf.mxu0 }
  0x8e   :  { %v57_v9 = vpop.f32.mrf.mxu0 }
  0x96   :  { %v60_v10 = vpop.f32.mrf.mxu0 }
  0x9e   :  { %v63_v11 = vpop.f32.mrf.mxu0 }
  0x9f   :  { %90 = vmatpush.msra.mxu1 %v63_v11 }
  0xa1   :  { %91 = vmatpush.msra.mxu1 %v60_v10 }
  0xa3   :  { %92 = vmatpush.msra.mxu1 %v57_v9 }
  0xa5   :  { %93 = vmatpush.msra.mxu1 %v54_v8 }
  0xa6   :  { %408 = vmatmul.msk.f32.vlgmr.msra.gmra.mxu1 %vm24_vm0, %v487_v16 }
  0xae   :  { %409 = vmatmul.msk.f32.gmra.mxu1 %vm24_vm0, %v506_v21 }
  0xb6   :  { %410 = vmatmul.msk.f32.gmra.mxu1 %vm24_vm0, %v525_v26 }
  0xbe   :  { %411 = vmatmul.msk.f32.gmra.mxu1 %vm24_vm0, %v538_v29 }
 0x123   :  { %v95_v32 = vpop.f32.mrf.mxu1 }
 0x124   :  { %v107_v33 = vmax.f32 %v95_v32, 0.0  ;;  %v360_v32 = vld [vmem:[%s705_s1 + $0x1b8] sm:$0xff] }
 0x126   :  { %143 = vmatmul.f32.vlgmr.msra.gmra.mxu2 %v107_v33  ;;  %v359_v33 = vld [vmem:[%s705_s1 + $0x1b0] sm:$0xff] }
 0x12b   :  { %v98_v34 = vpop.f32.mrf.mxu1 }
 0x12c   :  { %v108_v35 = vmax.f32 %v98_v34, 0.0  ;;  %v358_v34 = vld [vmem:[%s705_s1 + $0x1a8] sm:$0xff] }
 0x12e   :  { %146 = vmatmul.f32.gmra.mxu2 %v108_v35 }
 0x133   :  { %v101_v36 = vpop.f32.mrf.mxu1 }
 0x134   :  { %v109_v37 = vmax.f32 %v101_v36, 0.0  ;;  %v357_v36 = vld [vmem:[%s705_s1 + $0x1a0] sm:$0xff] }
 0x136   :  { %149 = vmatmul.f32.gmra.mxu2 %v109_v37  ;;  %v356_v37 = vld [vmem:[%s705_s1 + $0x198] sm:$0xff] }
 0x13b   :  { %v104_v38 = vpop.f32.mrf.mxu1 }
 0x13c   :  { %v110_v39 = vmax.f32 %v104_v38, 0.0  ;;  %v355_v38 = vld [vmem:[%s705_s1 + $0x190] sm:$0xff] }
 0x13e   :  { %152 = vmatmul.f32.gmra.mxu2 %v110_v39  ;;  %v354_v39 = vld [vmem:[%s705_s1 + $0x188] sm:$0xff] }
 0x1a9   :  { %v144_v40 = vpop.f32.mrf.mxu2 }
 0x1b1   :  { %v147_v41 = vpop.f32.mrf.mxu2 }
 0x1b9   :  { %v150_v42 = vpop.f32.mrf.mxu2 }
 0x1c1   :  { %v153_v43 = vpop.f32.mrf.mxu2 }
 0x1c2   :  { %168 = vmatpush.msra.mxu3 %v153_v43  ;;  %v350_v43 = vld [vmem:[%s705_s1 + $0x168] sm:$0xff] }
 0x1c4   :  { %169 = vmatpush.msra.mxu3 %v150_v42  ;;  %v351_v42 = vld [vmem:[%s705_s1 + $0x170] sm:$0xff] }
 0x1c6   :  { %170 = vmatpush.msra.mxu3 %v147_v41  ;;  %v352_v41 = vld [vmem:[%s705_s1 + $0x178] sm:$0xff] }
 0x1c8   :  { %171 = vmatpush.msra.mxu3 %v144_v40  ;;  %v353_v40 = vld [vmem:[%s705_s1 + $0x180] sm:$0xff] }
 0x1c9   :  { %412 = vmatmul.msk.f32.vlgmr.msra.gmra.mxu3 %vm24_vm0, %v487_v16 }
 0x1d1   :  { %413 = vmatmul.msk.f32.gmra.mxu3 %vm24_vm0, %v506_v21 }
 0x1d9   :  { %414 = vmatmul.msk.f32.gmra.mxu3 %vm24_vm0, %v525_v26 }
 0x1e1   :  { %415 = vmatmul.msk.f32.gmra.mxu3 %vm24_vm0, %v538_v29 }
 0x24c   :  { %v173_v60 = vpop.f32.mrf.mxu3 }
 0x24d   :  { %v185_v61 = vmax.f32 %v173_v60, 0.0 }
 0x24f   :  { %221 = vmatmul.f32.vlgmr.msrb.gmra.mxu0 %v185_v61 }
 0x254   :  { %v176_v62 = vpop.f32.mrf.mxu3 }
 0x255   :  { %v186_v63 = vmax.f32 %v176_v62, 0.0 }
 0x257   :  { %224 = vmatmul.f32.gmra.mxu0 %v186_v63 }
 0x25c   :  { %v179_v0 = vpop.f32.mrf.mxu3 }
 0x25d   :  { %v187_v1 = vmax.f32 %v179_v0, 0.0 }
 0x25f   :  { %227 = vmatmul.f32.gmra.mxu0 %v187_v1 }
 0x264   :  { %v182_v2 = vpop.f32.mrf.mxu3 }
 0x265   :  { %v188_v3 = vmax.f32 %v182_v2, 0.0 }
 0x267   :  { %230 = vmatmul.f32.gmra.mxu0 %v188_v3 }
 0x2cc   :  { %v222_v4 = vpop.f32.mrf.mxu0 }
 0x2d4   :  { %v225_v5 = vpop.f32.mrf.mxu0 }
 0x2dc   :  { %v228_v6 = vpop.f32.mrf.mxu0 }
 0x2e4   :  { %v231_v7 = vpop.f32.mrf.mxu0 }
 0x2e5   :  { %246 = vmatpush.msrb.mxu1 %v231_v7 }
 0x2e7   :  { %247 = vmatpush.msrb.mxu1 %v228_v6 }
 0x2e9   :  { %248 = vmatpush.msrb.mxu1 %v225_v5 }
 0x2eb   :  { %249 = vmatpush.msrb.mxu1 %v222_v4 }
 0x2ec   :  { %416 = vmatmul.msk.f32.vlgmr.msrb.gmra.mxu1 %vm24_vm0, %v487_v16  ;;  %v19_v16 = vld [vmem:[%s706_s0 + $0x40] sm:$0xff]  ;;  %s428_s0 = smov 96  }
 0x2f4   :  { %417 = vmatmul.msk.f32.gmra.mxu1 %vm24_vm0, %v506_v21 }
 0x2fc   :  { %418 = vmatmul.msk.f32.gmra.mxu1 %vm24_vm0, %v525_v26  ;;  %v290_v26 = vld [vmem:[%s705_s1 + $0x120] sm:$0xff] }
 0x304   :  { %419 = vmatmul.msk.f32.gmra.mxu1 %vm24_vm0, %v538_v29  ;;  %v363_v29 = vld [vmem:[%s705_s1 + $0x1d0] sm:$0xff] }
 0x305   :  { %370 = vmatpush.msrb.mxu2 %v363_v29 }
 0x307   :  { %371 = vmatpush.msrb.mxu2 %v362_v30 }
 0x309   :  { %372 = vmatpush.msrb.mxu2 %v361_v31 }
 0x30b   :  { %373 = vmatpush.msrb.mxu2 %v360_v32 }
 0x30d   :  { %374 = vmatpush.msrb.mxu2 %v359_v33 }
 0x30f   :  { %375 = vmatpush.msrb.mxu2 %v358_v34 }
 0x311   :  { %376 = vmatpush.msrb.mxu2 %v357_v36 }
 0x313   :  { %377 = vmatpush.msrb.mxu2 %v356_v37 }
 0x315   :  { %378 = vmatpush.msrb.mxu2 %v355_v38 }
 0x317   :  { %379 = vmatpush.msrb.mxu2 %v354_v39 }
 0x319   :  { %380 = vmatpush.msrb.mxu2 %v353_v40 }
 0x31b   :  { %381 = vmatpush.msrb.mxu2 %v352_v41 }
 0x31d   :  { %382 = vmatpush.msrb.mxu2 %v351_v42 }
 0x31f   :  { %383 = vmatpush.msrb.mxu2 %v350_v43 }
 0x369   :  { %v251_v8 = vpop.f32.mrf.mxu1 }
 0x36a   :  { %v263_v15 = vmax.f32 %v251_v8, 0.0 }
 0x371   :  { %v254_v9 = vpop.f32.mrf.mxu1 }
 0x372   :  { %v264_v14 = vmax.f32 %v254_v9, 0.0 }
 0x379   :  { %v257_v10 = vpop.f32.mrf.mxu1 }
 0x37a   :  { %v265_v13 = vmax.f32 %v257_v10, 0.0 }
 0x381   :  { %v260_v11 = vpop.f32.mrf.mxu1 }
 0x382   :  { %v266_v12 = vmax.f32 %v260_v11, 0.0 }
 0x384   :  { %282 = vmatpush.msrb.mxu3 %v266_v12 }
 0x386   :  { %283 = vmatpush.msrb.mxu3 %v265_v13 }
 0x388   :  { %284 = vmatpush.msrb.mxu3 %v264_v14 }
 0x38a   :  { %285 = vmatpush.msrb.mxu3 %v263_v15 }
 0x38b   :  { %420 = vmatmul.msk.f32.vlgmr.msrb.gmra.mxu3 %vm24_vm0, %v19_v16 }
 0x38c   :  { %316 = vmatpush.msra.mxu3 %v297_v17 }
 0x38e   :  { %317 = vmatpush.msra.mxu3 %v296_v18 }
 0x390   :  { %318 = vmatpush.msra.mxu3 %v295_v19 }
 0x392   :  { %319 = vmatpush.msra.mxu3 %v294_v20 }
 0x394   :  { %338 = vmatpush.msrb.mxu3 %v293_v23 }
 0x396   :  { %339 = vmatpush.msrb.mxu3 %v292_v24 }
 0x398   :  { %340 = vmatpush.msrb.mxu3 %v291_v25 }
 0x39a   :  { %341 = vmatpush.msrb.mxu3 %v290_v26 }
 0x40e   :  { %v287_v21 = vpop.f32.mrf.mxu3 }
 0x40f   :  { %v299_v22 = vrot.slane %v287_v21, 2 }
 0x411   :  { %300 = vrot.lane.b32.xlu0 %v299_v22, %s428_s0 }
 0x483   :  { %v301_v35 = vpop.permute.xlu0 %300 }
 0x484   :  { %421 = vmatmul.msk.f32.vlgmr.msra.gmra.mxu3 %vm24_vm0, %v301_v35 }
 0x48c   :  { %422 = vmatmul.msk.f32.vlgmr.msrb.gmra.mxu3 %vm24_vm0, %v287_v21 }
 0x507   :  { %v321_v44 = vpop.f32.mrf.mxu3 }
 0x50f   :  { %v343_v46 = vpop.f32.mrf.mxu3 }
 0x510   :  { %v344_v47 = vadd.f32 %v343_v46, %v321_v44 }
 0x512   :  { %v348_v48 = vadd.f32 %v424_v45, %v344_v47 }
 0x514   :  { %v349_v49 = vmax.f32 %v348_v48, 0.0 }
 0x516   :  { %384 = vmatmul.f32.vlgmr.msrb.gmra.mxu2 %v349_v49 }
 0x599   :  { %v385_v51 = vpop.f32.mrf.mxu2 }
 0x59a   :  { %v386_v52 = vadd.f32 %v425_v50, %v385_v51 }
 0x59c   :  { %v388_v54 = vmax.f32 %v386_v52, 0.0 }
 0x59e   :  { %v391_v55 = vmul.f32 %v426_v53, %v388_v54 }
 0x5a0   :  { %v393_v56 = vsel %vm392_vm1, %v391_v55, 0.0 }
 0x5a1   :  { %394 = vadd.xlane.f32.xlu0 %v393_v56 }
 0x614   :  { %v395_v58 = vpop.xlane.xlu0 %394 }
 0x615   :  { %v398_v59 = vadd.f32 %v427_v57, %v395_v58 }
 0x617   :  { %399 = vst [vmem:[%s707_s2] sm:$0x3] %v398_v59 }

</bundles_post_ra>
